<compile_context>
chip_gen: v5e
topology: v5e:2x2
jax: 0.10.0
libtpu: 0.0.40
codegen_flags: <defaults>
</compile_context>

<pallas_src>
import functools

import jax
import jax.numpy as jnp
import numpy as np
from jax import lax
from jax.experimental import pallas as pl
from jax.experimental.pallas import tpu as pltpu


def _round_up(n, m):
    return ((n + m - 1) // m) * m


def _param_offsets(D, H):
    """Row offsets of each packed parameter inside the (rows, 128) slab (sublane-aligned)."""
    assert 2 * H <= 128, "combined hidden state [h0|h1] must fit one 128-lane row"
    offs = {}
    r = 0
    offs["wih0"] = r;  r += _round_up(D, 8)        # (D, 2H)  = [Wih0 | 0]
    offs["wcomb"] = r; r += _round_up(2 * H, 8)    # (2H, 2H) = [[Whh0, Wih1], [0, Whh1]]
    offs["wout"] = r;  r += _round_up(H, 8)        # (H, C)
    offs["b01"] = r;   r += 1                      # (1, 2H)  = [b0 | b1]
    offs["bout"] = r;  r += 1                      # (1, C)
    rows = _round_up(r, 8)
    return offs, rows


def pack_params(p, D, H, C):
    """Pack all weights/biases into one contiguous, lane-aligned f32 slab (host-side, once)."""
    offs, rows = _param_offsets(D, H)
    slab = np.zeros((rows, 128), np.float32)
    # layer-0 input weights, zero right half so x @ wih0_wide leaves the b1 gate half untouched
    slab[offs["wih0"]:offs["wih0"] + D, 0:H] = np.asarray(p["wih0"])
    # combined recurrent / cross-layer weight for the wavefront update [h0 | h1] @ wcomb
    o = offs["wcomb"]
    slab[o:o + H, 0:H] = np.asarray(p["whh0"])
    slab[o:o + H, H:2 * H] = np.asarray(p["wih1"])
    slab[o + H:o + 2 * H, H:2 * H] = np.asarray(p["whh1"])
    slab[offs["wout"]:offs["wout"] + H, 0:C] = np.asarray(p["wout"])
    slab[offs["b01"], 0:H] = np.asarray(p["b0"]).reshape(H)
    slab[offs["b01"], H:2 * H] = np.asarray(p["b1"]).reshape(H)
    slab[offs["bout"], 0:C] = np.asarray(p["bout"]).reshape(C)
    return jnp.asarray(slab), offs


def _forecast_cat_kernel(x_ref, w_ref, out_ref, xg_ref, *, H, C, offs, unroll):
    """One batch tile of the full forward pass.

    x_ref:   (Bb, T, D)     batch-first input tile
    w_ref:   (rows, 128)    packed parameter slab (resident; constant index_map)
    out_ref: (Bb, C)        softmax probabilities
    xg_ref:  (Bb, T, 2H)    VMEM scratch for the precomputed gates (used on the fori_loop path)
    """
    Bb, T, D = x_ref.shape
    H2 = 2 * H

    # ---- one-time, static-slice loads of all parameters from the packed slab ----
    wih0 = w_ref[offs["wih0"]:offs["wih0"] + D, 0:H2]        # (D, 2H), right half zero
    wcomb = w_ref[offs["wcomb"]:offs["wcomb"] + H2, 0:H2]    # (2H, 2H) block-triangular
    wout = w_ref[offs["wout"]:offs["wout"] + H, 0:C]         # (H, C)
    b01 = w_ref[offs["b01"]:offs["b01"] + 1, 0:H2]           # (1, 2H) = [b0 | b1]
    bout = w_ref[offs["bout"]:offs["bout"] + 1, 0:C]         # (1, C)

    # ---- hoisted non-recurrent matmul: all layer-0 gates in one MXU pass ----
    # gates(t) = [x(t) @ Wih0 + b0 | b1]   (upper half is the constant layer-1 bias)
    x2d = x_ref[...].reshape(Bb * T, D)
    gates = jnp.dot(x2d, wih0, preferred_element_type=jnp.float32) + b01     # (Bb*T, 2H)

    if unroll:
        # small T: keep gates as a value, static per-step slices, fully unrolled loop
        gates3 = gates.reshape(Bb, T, H2)

        def gate(t):
            return gates3[:, t, :]
    else:
        # large T: park gates in an explicit VMEM scratch; per-step read is one sublane row
        xg_ref[...] = gates.reshape(Bb, T, H2)

        def gate(t):
            return xg_ref[:, pl.ds(t, 1), :].reshape(Bb, H2)

    # ---- wavefront-interleaved 2-layer recurrence -------------------------------------------
    # carry s = [h0(t-1) | h1(t-2)];   rec = s @ wcomb = [h0@Whh0 | h0@Wih1 + h1@Whh1]
    # s_new = tanh(gate(t) + rec) = [h0(t) | h1(t-1)]   -> one dot + one tanh per step.
    # Peel t = 0:  h0(0) = tanh(x(0)@Wih0 + b0),  h1(-1) = 0  (PyTorch zero initial state).
    lane = lax.broadcasted_iota(jnp.int32, (Bb, H2), 1)
    s = jnp.where(lane < H, jnp.tanh(gate(0)), 0.0)

    def step(t, s):
        rec = jnp.dot(s, wcomb, preferred_element_type=jnp.float32)
        return jnp.tanh(gate(t) + rec)

    if unroll:
        for t in range(1, T):
            s = step(t, s)
    else:
        s = lax.fori_loop(1, T, step, s)

    # epilogue: h1(T-1) = tanh(h0(T-1) @ Wih1 + h1(T-2) @ Whh1 + b1)
    rec = jnp.dot(s, wcomb, preferred_element_type=jnp.float32)
    h_last = jnp.tanh(rec + b01)[:, H:H2]

    # core_out[:, -1, :] == h_last (top layer, last step). Linear -> softmax(dim=1).
    logits = jnp.dot(h_last, wout, preferred_element_type=jnp.float32) + bout
    m = jnp.max(logits, axis=1, keepdims=True)
    e = jnp.exp(logits - m)
    denom = jnp.sum(e, axis=1, keepdims=True)
    out_ref[...] = e * pl.reciprocal(denom, approx=True)


def _pick_block_b(B, T, H):
    """Batch-tile size: multiple of 8 dividing B, capped for >=2 grid programs and VMEM."""
    if B <= 8 or B % 8 != 0:
        return B                                   # tiny / odd batch: single program
    scratch_per_row = T * 2 * H * 4                # gate-scratch bytes per batch row
    cap = max(8, min(64, ((4 << 20) // max(scratch_per_row, 1)) // 8 * 8))
    if B >= 16:
        cap = min(cap, max(8, (B // 2) // 8 * 8))  # >= 2 programs (v7x: 2 TensorCores)
    bb = 8
    while bb * 2 <= cap and B % (bb * 2) == 0:
        bb *= 2
    return bb


def forecasting_model_cat(x, slab, offs, *, H, C):
    """x: (B, T, D) batch-first float32 (same layout as the PyTorch module)."""
    B, T, D = x.shape
    rows = slab.shape[0]
    block_b = _pick_block_b(B, T, H)
    grid = (B // block_b,)

    # explicit VMEM budget: double-buffered x tile + resident slab (2 bufs) + gate scratch + out
    est = (2 * block_b * T * D * 4 + block_b * T * 2 * H * 4
           + 2 * rows * 128 * 4 + 2 * block_b * 128 * 4)
    vmem_limit = int(min(max(2 * est + (2 << 20), 16 << 20), 48 << 20))

    kernel = functools.partial(_forecast_cat_kernel, H=H, C=C, offs=offs, unroll=(T <= 32))

    return pl.pallas_call(
        kernel,
        out_shape=jax.ShapeDtypeStruct((B, C), jnp.float32),
        grid_spec=pltpu.PrefetchScalarGridSpec(
            num_scalar_prefetch=0,
            grid=grid,
            in_specs=[
                pl.BlockSpec((block_b, T, D), lambda i: (i, 0, 0)),   # batch-first x tile
                pl.BlockSpec((rows, 128), lambda i: (0, 0)),          # packed params, resident
            ],
            out_specs=pl.BlockSpec((block_b, C), lambda i: (i, 0)),
            scratch_shapes=[pltpu.VMEM((block_b, T, 2 * H), jnp.float32)],
        ),
        compiler_params=pltpu.CompilerParams(
            dimension_semantics=("parallel",),
            vmem_limit_bytes=vmem_limit),
    )(x, slab)


def init_params(key, data_dim, hidden_dim, num_classes):
    """PyTorch-default-style init: U(-1/sqrt(H), 1/sqrt(H)); weights stored pre-transposed (in, out)."""
    ks = jax.random.split(key, 12)
    s_rnn = 1.0 / np.sqrt(hidden_dim)
    s_lin = 1.0 / np.sqrt(hidden_dim)

    def u(k, shape, s):
        return jax.random.uniform(k, shape, jnp.float32, -s, s)

    wih0 = u(ks[0], (data_dim, hidden_dim), s_rnn)           # weight_ih_l0.T
    whh0 = u(ks[1], (hidden_dim, hidden_dim), s_rnn)         # weight_hh_l0.T
    b0 = (u(ks[2], (hidden_dim,), s_rnn) + u(ks[3], (hidden_dim,), s_rnn)).reshape(1, hidden_dim)
    wih1 = u(ks[4], (hidden_dim, hidden_dim), s_rnn)
    whh1 = u(ks[5], (hidden_dim, hidden_dim), s_rnn)
    b1 = (u(ks[6], (hidden_dim,), s_rnn) + u(ks[7], (hidden_dim,), s_rnn)).reshape(1, hidden_dim)
    wout = u(ks[8], (hidden_dim, num_classes), s_lin)        # output_layer.weight.T
    bout = u(ks[9], (num_classes,), s_lin).reshape(1, num_classes)

    return dict(wih0=wih0, whh0=whh0, b0=b0,
                wih1=wih1, whh1=whh1, b1=b1,
                wout=wout, bout=bout)


def reference_forward(x, p):
    """Pure-JAX reference of the same forward pass (for correctness check)."""
    B, T, D = x.shape
    H = p["whh0"].shape[0]
    h0 = jnp.zeros((B, H), jnp.float32)
    h1 = jnp.zeros((B, H), jnp.float32)
    for t in range(T):
        xt = x[:, t, :]
        h0 = jnp.tanh(xt @ p["wih0"] + h0 @ p["whh0"] + p["b0"])
        h1 = jnp.tanh(h0 @ p["wih1"] + h1 @ p["whh1"] + p["b1"])
    logits = h1 @ p["wout"] + p["bout"]
    return jax.nn.softmax(logits, axis=1)


if __name__ == "__main__":
    B, T, D, H, C = 2, 8, 4, 32, 3   # batch, seq_len, data_dim, hidden_dim, num_classes

    key = jax.random.PRNGKey(0)
    kx, kp = jax.random.split(key)
    x = jax.random.normal(kx, (B, T, D), jnp.float32)
    params = init_params(kp, D, H, C)
    slab, offs = pack_params(params, D, H, C)

    fwd = jax.jit(lambda xx, ss: forecasting_model_cat(xx, ss, offs, H=H, C=C))
    out = jax.block_until_ready(fwd(x, slab))

    ref = reference_forward(x, params)
    # tolerance covers the EUP approximate-reciprocal softmax normalization (~2^-12 rel. error)
    np.testing.assert_allclose(np.asarray(out), np.asarray(ref), rtol=2e-3, atol=2e-3)
    np.testing.assert_allclose(np.asarray(out).sum(axis=1), np.ones(B), rtol=2e-3, atol=2e-3)

    print("KERNEL_OK")
</pallas_src>

<mosaic_0001>
module attributes {stable_mosaic.version = 11 : i64} {
  func.func @_forecast_cat_kernel(%arg0: i32, %arg1: memref<2x8x4xf32, #tpu.memory_space<vmem>>, %arg2: memref<112x128xf32, #tpu.memory_space<vmem>>, %arg3: memref<2x3xf32, #tpu.memory_space<vmem>>, %arg4: memref<2x8x64xf32, #tpu.memory_space<vmem>>) attributes {dimension_semantics = [#tpu.dimension_semantics<parallel>], iteration_bounds = array<i64: 1>, scalar_prefetch = 0 : i64, scratch_operands = 1 : i64, tpu.core_type = #tpu.core_type<tc>, window_params = [{transform_indices = @transform_0, window_bounds = array<i64: 2, 8, 4>}, {pipeline_mode = #tpu.pipeline_mode<synchronous>, transform_indices = @transform_1, window_bounds = array<i64: 112, 128>}, {transform_indices = @transform_2, window_bounds = array<i64: 2, 3>}]} {
    %c0 = arith.constant 0 : index
    %c0_0 = arith.constant 0 : index
    %0 = vector.load %arg2[%c0, %c0_0] : memref<112x128xf32, #tpu.memory_space<vmem>>, vector<4x64xf32>
    %c8 = arith.constant 8 : index
    %c0_1 = arith.constant 0 : index
    %1 = vector.load %arg2[%c8, %c0_1] : memref<112x128xf32, #tpu.memory_space<vmem>>, vector<64x64xf32>
    %c72 = arith.constant 72 : index
    %c0_2 = arith.constant 0 : index
    %2 = vector.load %arg2[%c72, %c0_2] : memref<112x128xf32, #tpu.memory_space<vmem>>, vector<32x3xf32>
    %c104 = arith.constant 104 : index
    %c0_3 = arith.constant 0 : index
    %3 = vector.load %arg2[%c104, %c0_3] : memref<112x128xf32, #tpu.memory_space<vmem>>, vector<1x64xf32>
    %c105 = arith.constant 105 : index
    %c0_4 = arith.constant 0 : index
    %4 = vector.load %arg2[%c105, %c0_4] : memref<112x128xf32, #tpu.memory_space<vmem>>, vector<1x3xf32>
    %c0_5 = arith.constant 0 : index
    %c0_6 = arith.constant 0 : index
    %c0_7 = arith.constant 0 : index
    %5 = vector.load %arg1[%c0_5, %c0_6, %c0_7] : memref<2x8x4xf32, #tpu.memory_space<vmem>>, vector<2x8x4xf32>
    %6 = vector.shape_cast %5 : vector<2x8x4xf32> to vector<16x4xf32>
    %cst = arith.constant dense<0.000000e+00> : vector<16x64xf32>
    %7 = tpu.matmul %6, %0, %cst {dimension_numbers = #tpu.dot_dimension_numbers<[1], [0], [0], [1], [0, 0, 1, 1], [], []>} : vector<16x4xf32>, vector<4x64xf32>, vector<16x64xf32> -> vector<16x64xf32>
    %8 = vector.broadcast %3 : vector<1x64xf32> to vector<16x64xf32>
    %9 = arith.addf %7, %8 : vector<16x64xf32>
    %10 = vector.shape_cast %9 : vector<16x64xf32> to vector<2x8x64xf32>
    %11 = tpu.iota {dimensions = array<i32: 1>} : vector<2x64xi32>
    %c32_i32 = arith.constant 32 : i32
    %12 = vector.broadcast %c32_i32 : i32 to vector<2x64xi32>
    %13 = arith.cmpi slt, %11, %12 : vector<2x64xi32>
    %14 = vector.extract_strided_slice %10 {offsets = [0, 0, 0], sizes = [2, 1, 64], strides = [1, 1, 1]} : vector<2x8x64xf32> to vector<2x1x64xf32>
    %15 = vector.shape_cast %14 : vector<2x1x64xf32> to vector<2x64xf32>
    %16 = math.tanh %15 : vector<2x64xf32>
    %cst_8 = arith.constant 0.000000e+00 : f32
    %17 = vector.broadcast %cst_8 : f32 to vector<2x64xf32>
    %18 = arith.select %13, %16, %17 : vector<2x64xi1>, vector<2x64xf32>
    %cst_9 = arith.constant dense<0.000000e+00> : vector<2x64xf32>
    %19 = tpu.matmul %18, %1, %cst_9 {dimension_numbers = #tpu.dot_dimension_numbers<[1], [0], [0], [1], [0, 0, 1, 1], [], []>} : vector<2x64xf32>, vector<64x64xf32>, vector<2x64xf32> -> vector<2x64xf32>
    %20 = vector.extract_strided_slice %10 {offsets = [0, 1, 0], sizes = [2, 1, 64], strides = [1, 1, 1]} : vector<2x8x64xf32> to vector<2x1x64xf32>
    %21 = vector.shape_cast %20 : vector<2x1x64xf32> to vector<2x64xf32>
    %22 = arith.addf %21, %19 : vector<2x64xf32>
    %23 = math.tanh %22 : vector<2x64xf32>
    %cst_10 = arith.constant dense<0.000000e+00> : vector<2x64xf32>
    %24 = tpu.matmul %23, %1, %cst_10 {dimension_numbers = #tpu.dot_dimension_numbers<[1], [0], [0], [1], [0, 0, 1, 1], [], []>} : vector<2x64xf32>, vector<64x64xf32>, vector<2x64xf32> -> vector<2x64xf32>
    %25 = vector.extract_strided_slice %10 {offsets = [0, 2, 0], sizes = [2, 1, 64], strides = [1, 1, 1]} : vector<2x8x64xf32> to vector<2x1x64xf32>
    %26 = vector.shape_cast %25 : vector<2x1x64xf32> to vector<2x64xf32>
    %27 = arith.addf %26, %24 : vector<2x64xf32>
    %28 = math.tanh %27 : vector<2x64xf32>
    %cst_11 = arith.constant dense<0.000000e+00> : vector<2x64xf32>
    %29 = tpu.matmul %28, %1, %cst_11 {dimension_numbers = #tpu.dot_dimension_numbers<[1], [0], [0], [1], [0, 0, 1, 1], [], []>} : vector<2x64xf32>, vector<64x64xf32>, vector<2x64xf32> -> vector<2x64xf32>
    %30 = vector.extract_strided_slice %10 {offsets = [0, 3, 0], sizes = [2, 1, 64], strides = [1, 1, 1]} : vector<2x8x64xf32> to vector<2x1x64xf32>
    %31 = vector.shape_cast %30 : vector<2x1x64xf32> to vector<2x64xf32>
    %32 = arith.addf %31, %29 : vector<2x64xf32>
    %33 = math.tanh %32 : vector<2x64xf32>
    %cst_12 = arith.constant dense<0.000000e+00> : vector<2x64xf32>
    %34 = tpu.matmul %33, %1, %cst_12 {dimension_numbers = #tpu.dot_dimension_numbers<[1], [0], [0], [1], [0, 0, 1, 1], [], []>} : vector<2x64xf32>, vector<64x64xf32>, vector<2x64xf32> -> vector<2x64xf32>
    %35 = vector.extract_strided_slice %10 {offsets = [0, 4, 0], sizes = [2, 1, 64], strides = [1, 1, 1]} : vector<2x8x64xf32> to vector<2x1x64xf32>
    %36 = vector.shape_cast %35 : vector<2x1x64xf32> to vector<2x64xf32>
    %37 = arith.addf %36, %34 : vector<2x64xf32>
    %38 = math.tanh %37 : vector<2x64xf32>
    %cst_13 = arith.constant dense<0.000000e+00> : vector<2x64xf32>
    %39 = tpu.matmul %38, %1, %cst_13 {dimension_numbers = #tpu.dot_dimension_numbers<[1], [0], [0], [1], [0, 0, 1, 1], [], []>} : vector<2x64xf32>, vector<64x64xf32>, vector<2x64xf32> -> vector<2x64xf32>
    %40 = vector.extract_strided_slice %10 {offsets = [0, 5, 0], sizes = [2, 1, 64], strides = [1, 1, 1]} : vector<2x8x64xf32> to vector<2x1x64xf32>
    %41 = vector.shape_cast %40 : vector<2x1x64xf32> to vector<2x64xf32>
    %42 = arith.addf %41, %39 : vector<2x64xf32>
    %43 = math.tanh %42 : vector<2x64xf32>
    %cst_14 = arith.constant dense<0.000000e+00> : vector<2x64xf32>
    %44 = tpu.matmul %43, %1, %cst_14 {dimension_numbers = #tpu.dot_dimension_numbers<[1], [0], [0], [1], [0, 0, 1, 1], [], []>} : vector<2x64xf32>, vector<64x64xf32>, vector<2x64xf32> -> vector<2x64xf32>
    %45 = vector.extract_strided_slice %10 {offsets = [0, 6, 0], sizes = [2, 1, 64], strides = [1, 1, 1]} : vector<2x8x64xf32> to vector<2x1x64xf32>
    %46 = vector.shape_cast %45 : vector<2x1x64xf32> to vector<2x64xf32>
    %47 = arith.addf %46, %44 : vector<2x64xf32>
    %48 = math.tanh %47 : vector<2x64xf32>
    %cst_15 = arith.constant dense<0.000000e+00> : vector<2x64xf32>
    %49 = tpu.matmul %48, %1, %cst_15 {dimension_numbers = #tpu.dot_dimension_numbers<[1], [0], [0], [1], [0, 0, 1, 1], [], []>} : vector<2x64xf32>, vector<64x64xf32>, vector<2x64xf32> -> vector<2x64xf32>
    %50 = vector.extract_strided_slice %10 {offsets = [0, 7, 0], sizes = [2, 1, 64], strides = [1, 1, 1]} : vector<2x8x64xf32> to vector<2x1x64xf32>
    %51 = vector.shape_cast %50 : vector<2x1x64xf32> to vector<2x64xf32>
    %52 = arith.addf %51, %49 : vector<2x64xf32>
    %53 = math.tanh %52 : vector<2x64xf32>
    %cst_16 = arith.constant dense<0.000000e+00> : vector<2x64xf32>
    %54 = tpu.matmul %53, %1, %cst_16 {dimension_numbers = #tpu.dot_dimension_numbers<[1], [0], [0], [1], [0, 0, 1, 1], [], []>} : vector<2x64xf32>, vector<64x64xf32>, vector<2x64xf32> -> vector<2x64xf32>
    %55 = vector.broadcast %3 : vector<1x64xf32> to vector<2x64xf32>
    %56 = arith.addf %54, %55 : vector<2x64xf32>
    %57 = math.tanh %56 : vector<2x64xf32>
    %58 = vector.extract_strided_slice %57 {offsets = [0, 32], sizes = [2, 32], strides = [1, 1]} : vector<2x64xf32> to vector<2x32xf32>
    %cst_17 = arith.constant dense<0.000000e+00> : vector<2x3xf32>
    %59 = tpu.matmul %58, %2, %cst_17 {dimension_numbers = #tpu.dot_dimension_numbers<[1], [0], [0], [1], [0, 0, 1, 1], [], []>} : vector<2x32xf32>, vector<32x3xf32>, vector<2x3xf32> -> vector<2x3xf32>
    %60 = vector.broadcast %4 : vector<1x3xf32> to vector<2x3xf32>
    %61 = arith.addf %59, %60 : vector<2x3xf32>
    %cst_18 = arith.constant dense<0xFF800000> : vector<2xf32>
    %62 = vector.multi_reduction <maximumf>, %61, %cst_18 [1] : vector<2x3xf32> to vector<2xf32>
    %63 = vector.shape_cast %62 : vector<2xf32> to vector<2x1xf32>
    %64 = vector.broadcast %63 : vector<2x1xf32> to vector<2x3xf32>
    %65 = arith.subf %61, %64 : vector<2x3xf32>
    %66 = math.exp %65 : vector<2x3xf32>
    %cst_19 = arith.constant dense<0.000000e+00> : vector<2xf32>
    %67 = vector.multi_reduction <add>, %66, %cst_19 [1] : vector<2x3xf32> to vector<2xf32>
    %68 = vector.shape_cast %67 : vector<2xf32> to vector<2x1xf32>
    %69 = tpu.reciprocal %68 {approx = true} : vector<2x1xf32> -> vector<2x1xf32>
    %70 = vector.broadcast %69 : vector<2x1xf32> to vector<2x3xf32>
    %71 = arith.mulf %66, %70 : vector<2x3xf32>
    %c0_20 = arith.constant 0 : index
    %c0_21 = arith.constant 0 : index
    %72 = vector.load %arg3[%c0_20, %c0_21] : memref<2x3xf32, #tpu.memory_space<vmem>>, vector<2x3xf32>
    tpu.vector_store %arg3[%c0_20, %c0_21], %71 {strides = array<i32>} : memref<2x3xf32, #tpu.memory_space<vmem>>, vector<2x3xf32>,
    return
  }
  func.func @transform_0(%arg0: i32) -> (i32, i32, i32) {
    %c0_i32 = arith.constant 0 : i32
    %c0_i32_0 = arith.constant 0 : i32
    %c0_i32_1 = arith.constant 0 : i32
    return %arg0, %c0_i32, %c0_i32_0 : i32, i32, i32
  }
  func.func @transform_1(%arg0: i32) -> (i32, i32) {
    %c0_i32 = arith.constant 0 : i32
    %c0_i32_0 = arith.constant 0 : i32
    %c0_i32_1 = arith.constant 0 : i32
    return %c0_i32, %c0_i32_0 : i32, i32
  }
  func.func @transform_2(%arg0: i32) -> (i32, i32) {
    %c0_i32 = arith.constant 0 : i32
    %c0_i32_0 = arith.constant 0 : i32
    return %arg0, %c0_i32 : i32, i32
  }
}

</mosaic_0001>

<bundles_post_ra>
// kernel: _lambda_.1
= control target key start
LH: loop header
LB: loop body
LE: loop exit
PB: predicated region body
PF: predicated region fallthrough
CT: control target
= control target key end

     0   :  { %7 = vsyncpa [#allocation4], 0  ;;  %s609_s0 = inlined_call_operand.vmem [shape: f32[2,8,4], index: 0, kind: input, shape index: {}]   ;;  %s610_s1 = inlined_call_operand.hbm [shape: f32[112,128], index: 1, kind: input, shape index: {}]   ;;  %s611_s2 = inlined_call_operand.hbm [shape: f32[2,3], index: 2, kind: output, shape index: {}]  }
   0x1   :  { %8 = vsyncpa [#allocation5], 0  ;;  %s15_s11 = sshll.u32 %s610_s1, 4  ;;  %s533_s12 = smov [#allocation3]   ;;  %s16_s11 = int_to_ptr.hbm [resolvable:$true] %s15_s11 }
   0x2   :  { %s17_s13 = sshll.u32 %s533_s12, 4  ;;  %s534_s14 = smov 128   ;;  %s18_s13 = int_to_ptr.vmem [resolvable:$true] %s17_s13 }
   0x3   :  { %s535_s15 = smov 8  }
   0x4   :  { %23 = dma.hbm_to_vmem [thread:$0]  %s16_s11, 1792, %s18_s13, [#allocation4], %s534_s14, %s534_s14, %s535_s15  }
   0x5   :  { %529 = dma.done.wait [#allocation4], 1792  }
   0x6   :  { %530 = vsyncadd [#allocation4], 4294965504  ;;  %vm53_vm0 = vcmask 1043456   ;;  %vm46_vm1 = vcmask 31744   ;;  %v28_v0 = vld [vmem:[#allocation3] sm:$0xf]  ;;  %v80_v16 = vlaneseq }
   0x7   :  { %v43_v1 = vld [vmem:[%s609_s0] sm:$0xff]  ;;  %424 = vmatpush.msk.msra.mxu0 %vm53_vm0, %v28_v0  ;;  %v44_v2 = vld [vmem:[%s609_s0 + $0x8] sm:$0xff]  ;;  %v35_v4 = vld [vmem:[#allocation3 + $0x38] sm:$0xff]  ;;  %vm88_vm2 = vcmask 1041409   ;;  %vm92_vm4 = vcmask 523264   ;;  %s536_s0 = smov 96  }
   0x8   :  { %425 = vmatmul.msk.f32.vlgmr.msra.gmra.mxu0 %vm46_vm1, %v43_v1  ;;  %v36_v3 = vld [vmem:[#allocation3 + $0x40] sm:$0xff]  ;;  %v34_v5 = vld [vmem:[#allocation3 + $0x30] sm:$0xff]  ;;  %v33_v6 = vld [vmem:[#allocation3 + $0x28] sm:$0xff]  ;;  %v81_v17 = vand.u32 127, %v80_v16  ;;  %vm371_vm5 = vcmask 261120   ;;  %vm394_vm6 = vcmask 17408  }
   0x9   :  { %104 = vmatpush.msra.mxu1 %v36_v3  ;;  %138 = vmatpush.msra.mxu2 %v36_v3  ;;  %v32_v7 = vld [vmem:[#allocation3 + $0x20] sm:$0xff]  ;;  %v31_v8 = vld [vmem:[#allocation3 + $0x18] sm:$0xff]  ;;  %v30_v9 = vld [vmem:[#allocation3 + $0x10] sm:$0xff]  ;;  %s537_s19 = smov [#allocation6]   ;;  %s414_s23 = sshll.u32 %s611_s2, 4  ;;  %s415_s23 = int_to_ptr.hbm [resolvable:$true] %s414_s23 }
   0xa   :  { %174 = vmatpush.msra.mxu3 %v36_v3  ;;  %210 = vmatpush.msrb.mxu0 %v36_v3  ;;  %v29_v10 = vld [vmem:[#allocation3 + $0x8] sm:$0xff]  ;;  %vm82_vm3 = vcmp.lt.s32.totalorder %v81_v17, 32  ;;  %s412_s20 = sshll.u32 %s537_s19, 4  ;;  %s413_s20 = int_to_ptr.vmem [resolvable:$true] %s412_s20 }
   0xb   :  { %105 = vmatpush.msra.mxu1 %v35_v4  ;;  %139 = vmatpush.msra.mxu2 %v35_v4  ;;  %v562_v12 = vld [vmem:[#allocation3 + $0x68] ss:$0 sm:$0xff] }
   0xc   :  { %175 = vmatpush.msra.mxu3 %v35_v4  ;;  %211 = vmatpush.msrb.mxu0 %v35_v4 }
   0xd   :  { %106 = vmatpush.msra.mxu1 %v34_v5  ;;  %140 = vmatpush.msra.mxu2 %v34_v5 }
   0xe   :  { %176 = vmatpush.msra.mxu3 %v34_v5  ;;  %212 = vmatpush.msrb.mxu0 %v34_v5 }
   0xf   :  { %107 = vmatpush.msra.mxu1 %v33_v6  ;;  %141 = vmatpush.msra.mxu2 %v33_v6 }
  0x10   :  { %426 = vmatmul.msk.f32.gmra.mxu0 %vm46_vm1, %v44_v2  ;;  %177 = vmatpush.msra.mxu3 %v33_v6 }
  0x11   :  { %213 = vmatpush.msrb.mxu0 %v33_v6  ;;  %108 = vmatpush.msra.mxu1 %v32_v7 }
  0x12   :  { %142 = vmatpush.msra.mxu2 %v32_v7  ;;  %178 = vmatpush.msra.mxu3 %v32_v7 }
  0x13   :  { %214 = vmatpush.msrb.mxu0 %v32_v7  ;;  %109 = vmatpush.msra.mxu1 %v31_v8 }
  0x14   :  { %143 = vmatpush.msra.mxu2 %v31_v8  ;;  %179 = vmatpush.msra.mxu3 %v31_v8 }
  0x15   :  { %215 = vmatpush.msrb.mxu0 %v31_v8  ;;  %110 = vmatpush.msra.mxu1 %v30_v9 }
  0x16   :  { %144 = vmatpush.msra.mxu2 %v30_v9  ;;  %180 = vmatpush.msra.mxu3 %v30_v9 }
  0x17   :  { %216 = vmatpush.msrb.mxu0 %v30_v9  ;;  %111 = vmatpush.msra.mxu1 %v29_v10 }
  0x18   :  { %145 = vmatpush.msra.mxu2 %v29_v10  ;;  %181 = vmatpush.msra.mxu3 %v29_v10 }
  0x19   :  { %217 = vmatpush.msrb.mxu0 %v29_v10  ;;  %246 = vmatpush.msrb.mxu1 %v36_v3 }
  0x1a   :  { %282 = vmatpush.msrb.mxu2 %v36_v3  ;;  %318 = vmatpush.msrb.mxu3 %v36_v3 }
  0x1b   :  { %354 = vmatpush.msra.mxu0 %v36_v3  ;;  %247 = vmatpush.msrb.mxu1 %v35_v4 }
  0x1c   :  { %283 = vmatpush.msrb.mxu2 %v35_v4  ;;  %319 = vmatpush.msrb.mxu3 %v35_v4 }
  0x1d   :  { %355 = vmatpush.msra.mxu0 %v35_v4  ;;  %248 = vmatpush.msrb.mxu1 %v34_v5 }
  0x1e   :  { %284 = vmatpush.msrb.mxu2 %v34_v5  ;;  %320 = vmatpush.msrb.mxu3 %v34_v5 }
  0x1f   :  { %356 = vmatpush.msra.mxu0 %v34_v5  ;;  %249 = vmatpush.msrb.mxu1 %v33_v6 }
  0x20   :  { %285 = vmatpush.msrb.mxu2 %v33_v6  ;;  %321 = vmatpush.msrb.mxu3 %v33_v6 }
  0x21   :  { %357 = vmatpush.msra.mxu0 %v33_v6  ;;  %250 = vmatpush.msrb.mxu1 %v32_v7 }
  0x22   :  { %286 = vmatpush.msrb.mxu2 %v32_v7  ;;  %322 = vmatpush.msrb.mxu3 %v32_v7 }
  0x23   :  { %358 = vmatpush.msra.mxu0 %v32_v7  ;;  %251 = vmatpush.msrb.mxu1 %v31_v8 }
  0x24   :  { %287 = vmatpush.msrb.mxu2 %v31_v8  ;;  %323 = vmatpush.msrb.mxu3 %v31_v8 }
  0x25   :  { %359 = vmatpush.msra.mxu0 %v31_v8  ;;  %252 = vmatpush.msrb.mxu1 %v30_v9 }
  0x26   :  { %288 = vmatpush.msrb.mxu2 %v30_v9  ;;  %324 = vmatpush.msrb.mxu3 %v30_v9 }
  0x27   :  { %360 = vmatpush.msra.mxu0 %v30_v9  ;;  %253 = vmatpush.msrb.mxu1 %v29_v10 }
  0x28   :  { %289 = vmatpush.msrb.mxu2 %v29_v10  ;;  %325 = vmatpush.msrb.mxu3 %v29_v10 }
  0x29   :  { %361 = vmatpush.msra.mxu0 %v29_v10 }
  0x85   :  { %v74_v11 = vpop.f32.mrf.mxu0 }
  0x86   :  { %v565_v14 = vadd.f32 %v562_v12, %v74_v11 }
  0x8d   :  { %v77_v13 = vpop.f32.mrf.mxu0 }
  0x8e   :  { %v568_v15 = vadd.f32 %v562_v12, %v77_v13 }
  0x90   :  { %443 = vtanh.f32 %v568_v15 }
  0x91   :  { %445 = vtanh.f32 %v565_v14 }
  0x96   :  { %v444_v18 = vpop.eup %443 }
  0x97   :  { %v87_v19 = vrot.slane %v444_v18, 7  ;;  %v446_v20 = vpop.eup %445 }
  0x99   :  { %v89_v21 = vsel %vm88_vm2, %v87_v19, %v446_v20 }
  0x9a   :  { %v91_v22 = vsel %vm82_vm3, %v89_v21, 0.0 }
  0x9b   :  { %427 = vmatmul.msk.f32.vlgmr.msra.gmra.mxu1 %vm92_vm4, %v91_v22 }
 0x118   :  { %v113_v23 = vpop.f32.mrf.mxu1 }
 0x119   :  { %v117_v24 = vrot.slane %v113_v23, 7  ;;  %v121_v26 = vadd.f32 %v113_v23, %v568_v15 }
 0x11b   :  { %v120_v25 = vadd.f32 %v117_v24, %v565_v14 }
 0x11d   :  { %447 = vtanh.f32 %v120_v25 }
 0x11e   :  { %449 = vtanh.f32 %v121_v26 }
 0x123   :  { %v448_v27 = vpop.eup %447 }
 0x124   :  { %v126_v28 = vrot.slane %v448_v27, 1  ;;  %v450_v29 = vpop.eup %449 }
 0x126   :  { %v127_v30 = vsel %vm88_vm2, %v450_v29, %v126_v28 }
 0x127   :  { %428 = vmatmul.msk.f32.vlgmr.msra.gmra.mxu2 %vm92_vm4, %v127_v30  ;;  %v40_v30 = vld [vmem:[#allocation3 + $0x60] sm:$0xff] }
 0x128   :  { %386 = vmatpush.msra.mxu1 %v40_v30 }
 0x1aa   :  { %v147_v31 = vpop.f32.mrf.mxu2 }
 0x1ab   :  { %v151_v32 = vrot.slane %v147_v31, 6  ;;  %v152_v33 = vrot.slane %v147_v31, 7  ;;  %v39_v31 = vld [vmem:[#allocation3 + $0x58] sm:$0xff] }
 0x1ac   :  { %387 = vmatpush.msra.mxu1 %v39_v31 }
 0x1ad   :  { %v155_v34 = vadd.f32 %v151_v32, %v565_v14  ;;  %v156_v35 = vadd.f32 %v152_v33, %v568_v15  ;;  %v38_v32 = vld [vmem:[#allocation3 + $0x50] sm:$0xff]  ;;  %v37_v33 = vld [vmem:[#allocation3 + $0x48] sm:$0xff] }
 0x1ae   :  { %388 = vmatpush.msra.mxu1 %v38_v32 }
 0x1af   :  { %451 = vtanh.f32 %v155_v34 }
 0x1b0   :  { %453 = vtanh.f32 %v156_v35  ;;  %389 = vmatpush.msra.mxu1 %v37_v33 }
 0x1b5   :  { %v452_v36 = vpop.eup %451 }
 0x1b6   :  { %v454_v37 = vpop.eup %453  ;;  %v161_v38 = vrot.slane %v452_v36, 2  ;;  %v442_v36 = vld [vmem:[#allocation3 + $0x69] ss:$0 sm:$0xff] }
 0x1b7   :  { %v162_v39 = vrot.slane %v454_v37, 1 }
 0x1b9   :  { %v163_v40 = vsel %vm88_vm2, %v162_v39, %v161_v38 }
 0x1ba   :  { %429 = vmatmul.msk.f32.vlgmr.msra.gmra.mxu3 %vm92_vm4, %v163_v40 }
 0x23d   :  { %v183_v41 = vpop.f32.mrf.mxu3 }
 0x23e   :  { %v187_v42 = vrot.slane %v183_v41, 5  ;;  %v188_v43 = vrot.slane %v183_v41, 6 }
 0x240   :  { %v191_v44 = vadd.f32 %v187_v42, %v565_v14  ;;  %v192_v45 = vadd.f32 %v188_v43, %v568_v15 }
 0x242   :  { %455 = vtanh.f32 %v191_v44 }
 0x243   :  { %457 = vtanh.f32 %v192_v45 }
 0x248   :  { %v456_v46 = vpop.eup %455 }
 0x249   :  { %v458_v47 = vpop.eup %457  ;;  %v197_v48 = vrot.slane %v456_v46, 3 }
 0x24a   :  { %v198_v49 = vrot.slane %v458_v47, 2 }
 0x24c   :  { %v199_v50 = vsel %vm88_vm2, %v198_v49, %v197_v48 }
 0x24d   :  { %430 = vmatmul.msk.f32.vlgmr.msrb.gmra.mxu0 %vm92_vm4, %v199_v50 }
 0x2ca   :  { %v219_v51 = vpop.f32.mrf.mxu0 }
 0x2cb   :  { %v223_v52 = vrot.slane %v219_v51, 4  ;;  %v224_v53 = vrot.slane %v219_v51, 5 }
 0x2cd   :  { %v227_v54 = vadd.f32 %v223_v52, %v565_v14  ;;  %v228_v55 = vadd.f32 %v224_v53, %v568_v15 }
 0x2cf   :  { %459 = vtanh.f32 %v227_v54 }
 0x2d0   :  { %461 = vtanh.f32 %v228_v55 }
 0x2d5   :  { %v460_v56 = vpop.eup %459 }
 0x2d6   :  { %v462_v57 = vpop.eup %461  ;;  %v233_v58 = vrot.slane %v460_v56, 4 }
 0x2d7   :  { %v234_v59 = vrot.slane %v462_v57, 3 }
 0x2d9   :  { %v235_v60 = vsel %vm88_vm2, %v234_v59, %v233_v58 }
 0x2da   :  { %431 = vmatmul.msk.f32.vlgmr.msrb.gmra.mxu1 %vm92_vm4, %v235_v60 }
 0x357   :  { %v255_v61 = vpop.f32.mrf.mxu1 }
 0x358   :  { %v259_v62 = vrot.slane %v255_v61, 3  ;;  %v260_v63 = vrot.slane %v255_v61, 4 }
 0x35a   :  { %v263_v0 = vadd.f32 %v259_v62, %v565_v14  ;;  %v264_v1 = vadd.f32 %v260_v63, %v568_v15 }
 0x35c   :  { %463 = vtanh.f32 %v263_v0 }
 0x35d   :  { %465 = vtanh.f32 %v264_v1 }
 0x362   :  { %v464_v2 = vpop.eup %463 }
 0x363   :  { %v466_v3 = vpop.eup %465  ;;  %v269_v4 = vrot.slane %v464_v2, 5 }
 0x364   :  { %v270_v5 = vrot.slane %v466_v3, 4 }
 0x366   :  { %v271_v6 = vsel %vm88_vm2, %v270_v5, %v269_v4 }
 0x367   :  { %432 = vmatmul.msk.f32.vlgmr.msrb.gmra.mxu2 %vm92_vm4, %v271_v6 }
 0x3ea   :  { %v291_v7 = vpop.f32.mrf.mxu2 }
 0x3eb   :  { %v295_v8 = vrot.slane %v291_v7, 2  ;;  %v296_v9 = vrot.slane %v291_v7, 3 }
 0x3ed   :  { %v299_v10 = vadd.f32 %v295_v8, %v565_v14  ;;  %v300_v11 = vadd.f32 %v296_v9, %v568_v15 }
 0x3ef   :  { %467 = vtanh.f32 %v299_v10 }
 0x3f0   :  { %469 = vtanh.f32 %v300_v11 }
 0x3f5   :  { %v468_v13 = vpop.eup %467 }
 0x3f6   :  { %v470_v16 = vpop.eup %469  ;;  %v305_v17 = vrot.slane %v468_v13, 6 }
 0x3f7   :  { %v306_v18 = vrot.slane %v470_v16, 5 }
 0x3f9   :  { %v307_v19 = vsel %vm88_vm2, %v306_v18, %v305_v17 }
 0x3fa   :  { %433 = vmatmul.msk.f32.vlgmr.msrb.gmra.mxu3 %vm92_vm4, %v307_v19 }
 0x47d   :  { %v327_v20 = vpop.f32.mrf.mxu3 }
 0x47e   :  { %v331_v21 = vrot.slane %v327_v20, 1  ;;  %v332_v22 = vrot.slane %v327_v20, 2 }
 0x480   :  { %v335_v23 = vadd.f32 %v331_v21, %v565_v14  ;;  %v336_v24 = vadd.f32 %v332_v22, %v568_v15 }
 0x482   :  { %471 = vtanh.f32 %v335_v23 }
 0x483   :  { %473 = vtanh.f32 %v336_v24 }
 0x488   :  { %v472_v25 = vpop.eup %471 }
 0x489   :  { %v474_v26 = vpop.eup %473  ;;  %v341_v27 = vrot.slane %v472_v25, 7 }
 0x48a   :  { %v342_v28 = vrot.slane %v474_v26, 6 }
 0x48c   :  { %v343_v29 = vsel %vm88_vm2, %v342_v28, %v341_v27 }
 0x48d   :  { %434 = vmatmul.msk.f32.vlgmr.msra.gmra.mxu0 %vm92_vm4, %v343_v29 }
 0x50a   :  { %v363_v14 = vpop.f32.mrf.mxu0 }
 0x50b   :  { %v364_v15 = vadd.f32 %v562_v12, %v363_v14 }
 0x50d   :  { %475 = vtanh.f32 %v364_v15 }
 0x513   :  { %v476_v34 = vpop.eup %475 }
 0x514   :  { %369 = vrot.lane.b32.xlu0 %v476_v34, %s536_s0 }
 0x586   :  { %v370_v35 = vpop.permute.xlu0 %369 }
 0x587   :  { %435 = vmatmul.msk.f32.vlgmr.msra.gmra.mxu1 %vm371_vm5, %v370_v35 }
 0x604   :  { %v391_v37 = vpop.f32.mrf.mxu1 }
 0x605   :  { %v392_v38 = vadd.f32 %v442_v36, %v391_v37 }
 0x607   :  { %v395_v39 = vsel %vm394_vm6, %v392_v38, -inf }
 0x608   :  { %396 = vmax.xlane.f32.xlu0 %v395_v39 }
 0x67b   :  { %v397_v40 = vpop.xlane.xlu0 %396 }
 0x67c   :  { %v398_v41 = vsub.f32 %v392_v38, %v397_v40 }
 0x67e   :  { %v399_v42 = vmul.f32 1.442695, %v398_v41 }
 0x680   :  { %477 = vpow2.f32 %v399_v42 }
 0x686   :  { %v478_v43 = vpop.eup %477 }
 0x687   :  { %v401_v12 = vsel %vm394_vm6, %v478_v43, 0.0 }
 0x688   :  { %402 = vadd.xlane.f32.xlu1 %v401_v12 }
 0x6fb   :  { %v403_v44 = vpop.xlane.xlu1 %402 }
 0x6fc   :  { %479 = vrcp.f32 %v403_v44 }
 0x702   :  { %v480_v45 = vpop.eup %479 }
 0x703   :  { %v405_v46 = vmul.f32 %v480_v45, %v478_v43 }
 0x705   :  { %406 = vst.msk [vmem:[#allocation6] sm:$0x3] %vm394_vm6, %v405_v46 }
 0x706   :  { %417 = dma.vmem_to_hbm [thread:$0]  %s413_s20, 32, %s415_s23, [#allocation5]  }
 0x707   :  { %531 = dma.done.wait [#allocation5], 32  }
 0x708   :  { %532 = vsyncadd [#allocation5], 4294967264 }
 0x709   :  { %422 = vsyncpa [#allocation4], 1 }
 0x70a   :  { %423 = vsyncpa [#allocation5], 1 }

</bundles_post_ra>
